<compile_context>
chip_gen: v7x
topology: tpu7x:2x2x1
jax: 0.10.0
libtpu: 0.0.40
codegen_flags: <defaults>
</compile_context>

<pallas_src>
import functools

import jax
import jax.numpy as jnp
from jax import lax
from jax.experimental import pallas as pl
from jax.experimental.pallas import tpu as pltpu


# ----------------------------- Pallas kernel ------------------------------

def _fused_gcn_kernel(a_ref, x_ref, w_ref, b_ref, o_ref,
                      h_in, xw, h_acc,
                      *, n_real, num_layers, num_k, tk):
    """Grid = (layer, k). layer outer (sequential), k = src-node reduction.

    a_ref : (N_pad, tk)      stripe of A_hat columns for this k tile
    x_ref : (N_pad, F_PAD)   input node features (used only at layer 0)
    w_ref : (1, F_PAD, F_PAD) weights of the current layer
    b_ref : (1, 1, F_PAD)    bias of the current layer
    o_ref : (1, F_PAD)       pooled output (written once, at the very end)
    h_in  : VMEM (N_pad, F_PAD) current layer's input activations
    xw    : VMEM (N_pad, F_PAD) X @ W for the current layer
    h_acc : VMEM (N_pad, F_PAD) accumulator for A_hat @ (X @ W)
    """
    l = pl.program_id(0)
    k = pl.program_id(1)

    # Very first grid step: stage the input features into the resident scratch.
    @pl.when(jnp.logical_and(l == 0, k == 0))
    def _():
        h_in[...] = x_ref[...]

    # Layer prologue: compute X @ W once per layer, zero the accumulator.
    @pl.when(k == 0)
    def _():
        xw[...] = jnp.dot(h_in[...], w_ref[0],
                          preferred_element_type=jnp.float32)
        h_acc[...] = jnp.zeros_like(h_acc)

    # Reduction body: H += A_hat[:, k_tile] @ XW[k_tile, :]   (pure MXU)
    if num_k == 1:
        rhs = xw[...]
    else:
        k_start = pl.multiple_of(k * tk, tk)
        rhs = xw[pl.ds(k_start, tk), :]
    h_acc[...] += jnp.dot(a_ref[...], rhs, preferred_element_type=jnp.float32)

    last_k = k == num_k - 1

    # Hidden-layer epilogue: bias + relu, result becomes next layer's input.
    @pl.when(jnp.logical_and(last_k, l < num_layers - 1))
    def _():
        h_in[...] = jnp.maximum(h_acc[...] + b_ref[0], 0.0)

    # Last-layer epilogue: bias (no relu) + global mean pool over real nodes.
    @pl.when(jnp.logical_and(last_k, l == num_layers - 1))
    def _():
        h = h_acc[...] + b_ref[0]
        node_ids = lax.broadcasted_iota(jnp.int32, h.shape, 0)
        h = jnp.where(node_ids < n_real, h, 0.0)   # mask padded node rows
        o_ref[...] = (jnp.sum(h, axis=0, keepdims=True)
                      * (1.0 / float(n_real))).astype(o_ref.dtype)


# ------------------------------- glue (JAX) -------------------------------

def _round_up(v, m):
    return ((v + m - 1) // m) * m


def _pad_to(arr, shape):
    pads = [(0, t - s) for s, t in zip(arr.shape, shape)]
    return jnp.pad(arr, pads)


def build_norm_adj(edge_index, num_nodes):
    """Dense GCN-normalized adjacency with self loops.

    Matches torch_geometric GCNConv defaults: add_self_loops=True,
    normalize=True, edge_weight=1.
    """
    src = edge_index[0]
    dst = edge_index[1]
    loop = jnp.arange(num_nodes, dtype=src.dtype)
    src = jnp.concatenate([src, loop])
    dst = jnp.concatenate([dst, loop])
    deg = jnp.zeros((num_nodes,), jnp.float32).at[dst].add(1.0)
    dinv_sqrt = jnp.where(deg > 0, lax.rsqrt(deg), 0.0)
    norm = dinv_sqrt[src] * dinv_sqrt[dst]
    a_hat = jnp.zeros((num_nodes, num_nodes), jnp.float32).at[dst, src].add(norm)
    return a_hat


def init_params(key, in_channels, hidden_channels, out_channels, num_layers=3):
    """Deterministic glorot-uniform weights, zero bias (GCNConv defaults)."""
    dims = [in_channels] + [hidden_channels] * (num_layers - 1) + [out_channels]
    params = []
    for li in range(num_layers):
        f_in, f_out = dims[li], dims[li + 1]
        key, wk = jax.random.split(key)
        limit = jnp.sqrt(6.0 / (f_in + f_out))
        w = jax.random.uniform(wk, (f_in, f_out), jnp.float32, -limit, limit)
        b = jnp.zeros((1, f_out), jnp.float32)
        params.append((w, b))
    return params


def my_gcn_forward(x, edge_index, params):
    """Forward pass of MyGCN with batch=None (dropout p=0.0 -> identity)."""
    n_real, f_in0 = x.shape
    num_layers = len(params)
    f_out_last = params[-1][0].shape[1]

    # Lane-dense feature padding: every layer's feature dim padded to >=128.
    all_dims = [f_in0] + [w.shape[1] for w, _ in params]
    f_pad = _round_up(max(max(all_dims), 128), 128)

    # Node padding / k-tile for the A_hat stripe streaming.
    if n_real <= 512:
        n_pad = _round_up(n_real, 8)
        tk = n_pad                      # single k tile, A_hat loaded once
    else:
        tk = 512                        # multiple of 128 -> clean stripes
        n_pad = _round_up(n_real, tk)
    num_k = n_pad // tk

    # Build + pad operands (zero padding is exact: padded rows/cols never
    # pollute real rows, and padded node rows are masked out in the pool).
    a_hat = build_norm_adj(edge_index, n_real)
    a_hat_p = _pad_to(a_hat, (n_pad, n_pad))
    x_p = _pad_to(x.astype(jnp.float32), (n_pad, f_pad))
    w_stacked = jnp.stack([_pad_to(w.astype(jnp.float32), (f_pad, f_pad))
                           for w, _ in params])
    b_stacked = jnp.stack([_pad_to(b.astype(jnp.float32), (1, f_pad))
                           for _, b in params])

    kernel = functools.partial(
        _fused_gcn_kernel,
        n_real=n_real, num_layers=num_layers, num_k=num_k, tk=tk)

    flops = num_layers * (2 * n_pad * f_pad * f_pad        # X @ W
                          + 2 * n_pad * n_pad * f_pad)      # A_hat @ XW
    bytes_accessed = 4 * (n_pad * n_pad                     # A_hat
                          + n_pad * f_pad                   # X
                          + num_layers * (f_pad * f_pad + f_pad)  # W, b
                          + f_pad)                          # out
    cost = pl.CostEstimate(flops=flops, transcendentals=0,
                           bytes_accessed=bytes_accessed)

    out = pl.pallas_call(
        kernel,
        out_shape=jax.ShapeDtypeStruct((1, f_pad), jnp.float32),
        grid_spec=pltpu.PrefetchScalarGridSpec(
            num_scalar_prefetch=0,
            grid=(num_layers, num_k),
            in_specs=[
                # A_hat column stripe for the k reduction tile.
                pl.BlockSpec((n_pad, tk), lambda l, k: (0, k)),
                # Input features (constant block -> DMA'd once).
                pl.BlockSpec((n_pad, f_pad), lambda l, k: (0, 0)),
                # Per-layer weight / bias.
                pl.BlockSpec((1, f_pad, f_pad), lambda l, k: (l, 0, 0)),
                pl.BlockSpec((1, 1, f_pad), lambda l, k: (l, 0, 0)),
            ],
            # Constant block index -> output stays resident, written back once.
            out_specs=pl.BlockSpec((1, f_pad), lambda l, k: (0, 0)),
            scratch_shapes=[
                pltpu.VMEM((n_pad, f_pad), jnp.float32),  # h_in
                pltpu.VMEM((n_pad, f_pad), jnp.float32),  # xw
                pltpu.VMEM((n_pad, f_pad), jnp.float32),  # h_acc
            ],
        ),
        compiler_params=pltpu.CompilerParams(
            # layer axis is sequential, k is a reduction -> both arbitrary.
            dimension_semantics=("arbitrary", "arbitrary")),
        cost_estimate=cost,
    )(a_hat_p, x_p, w_stacked, b_stacked)

    return out[:, :f_out_last]


# ------------------------------- reference --------------------------------

def my_gcn_reference(x, edge_index, params):
    a_hat = build_norm_adj(edge_index, x.shape[0])
    num_layers = len(params)
    for i, (w, b) in enumerate(params):
        x = a_hat @ (x @ w) + b
        if i != num_layers - 1:
            x = jnp.maximum(x, 0.0)
    return jnp.mean(x, axis=0, keepdims=True)


# --------------------------------- main ------------------------------------

if __name__ == "__main__":
    key = jax.random.PRNGKey(0)
    key, xk = jax.random.split(key)

    num_nodes = 16
    in_channels, hidden_channels, out_channels = 8, 32, 8

    # Node features [N, in_channels].
    x = jax.random.normal(xk, (num_nodes, in_channels), jnp.float32)

    # Undirected ring graph, both edge directions, edge_index shape [2, E].
    idx = jnp.arange(num_nodes, dtype=jnp.int32)
    nxt = (idx + 1) % num_nodes
    edge_index = jnp.stack(
        [jnp.concatenate([idx, nxt]), jnp.concatenate([nxt, idx])], axis=0)

    params = init_params(key, in_channels, hidden_channels, out_channels,
                         num_layers=3)

    out = my_gcn_forward(x, edge_index, params)
    out = jax.block_until_ready(out)

    ref = my_gcn_reference(x, edge_index, params)
    assert out.shape == (1, out_channels), out.shape
    assert jnp.allclose(out, ref, atol=1e-4, rtol=1e-4), (out, ref)

    print("KERNEL_OK")
</pallas_src>

<mosaic_0001>
module attributes {stable_mosaic.version = 11 : i64} {
  func.func @_fused_gcn_kernel(%arg0: i32, %arg1: i32, %arg2: memref<16x16xf32, #tpu.memory_space<vmem>>, %arg3: memref<16x128xf32, #tpu.memory_space<vmem>>, %arg4: memref<1x128x128xf32, #tpu.memory_space<vmem>>, %arg5: memref<1x1x128xf32, #tpu.memory_space<vmem>>, %arg6: memref<1x128xf32, #tpu.memory_space<vmem>>, %arg7: memref<16x128xf32, #tpu.memory_space<vmem>>, %arg8: memref<16x128xf32, #tpu.memory_space<vmem>>, %arg9: memref<16x128xf32, #tpu.memory_space<vmem>>) attributes {dimension_semantics = [#tpu.dimension_semantics<arbitrary>, #tpu.dimension_semantics<arbitrary>], iteration_bounds = array<i64: 3, 1>, scalar_prefetch = 0 : i64, scratch_operands = 3 : i64, tpu.core_type = #tpu.core_type<tc>, window_params = [{transform_indices = @transform_0, window_bounds = array<i64: 16, 16>}, {pipeline_mode = #tpu.pipeline_mode<synchronous>, transform_indices = @transform_1, window_bounds = array<i64: 16, 128>}, {transform_indices = @transform_2, window_bounds = array<i64: 1, 128, 128>}, {transform_indices = @transform_3, window_bounds = array<i64: 1, 1, 128>}, {pipeline_mode = #tpu.pipeline_mode<synchronous>, transform_indices = @transform_4, window_bounds = array<i64: 1, 128>}]} {
    %c0_i32 = arith.constant 0 : i32
    %0 = arith.cmpi eq, %arg0, %c0_i32 : i32
    %c0_i32_0 = arith.constant 0 : i32
    %1 = arith.cmpi eq, %arg1, %c0_i32_0 : i32
    %2 = arith.andi %0, %1 : i1
    %3 = arith.extui %2 : i1 to i32
    %c0_i32_1 = arith.constant 0 : i32
    %4 = arith.cmpi ne, %3, %c0_i32_1 : i32
    scf.if %4 {
      %c0_15 = arith.constant 0 : index
      %c0_16 = arith.constant 0 : index
      %23 = vector.load %arg3[%c0_15, %c0_16] : memref<16x128xf32, #tpu.memory_space<vmem>>, vector<16x128xf32>
      %c0_17 = arith.constant 0 : index
      %c0_18 = arith.constant 0 : index
      %24 = vector.load %arg7[%c0_17, %c0_18] : memref<16x128xf32, #tpu.memory_space<vmem>>, vector<16x128xf32>
      tpu.vector_store %arg7[%c0_17, %c0_18], %23 {strides = array<i32>} : memref<16x128xf32, #tpu.memory_space<vmem>>, vector<16x128xf32>,
    } else {
    }
    %c0_i32_2 = arith.constant 0 : i32
    %5 = arith.cmpi eq, %arg1, %c0_i32_2 : i32
    %6 = arith.extui %5 : i1 to i32
    %c0_i32_3 = arith.constant 0 : i32
    %7 = arith.cmpi ne, %6, %c0_i32_3 : i32
    scf.if %7 {
      %c0_15 = arith.constant 0 : index
      %c0_16 = arith.constant 0 : index
      %23 = vector.load %arg7[%c0_15, %c0_16] : memref<16x128xf32, #tpu.memory_space<vmem>>, vector<16x128xf32>
      %c0_17 = arith.constant 0 : index
      %c0_18 = arith.constant 0 : index
      %c0_19 = arith.constant 0 : index
      %24 = vector.load %arg4[%c0_17, %c0_18, %c0_19] : memref<1x128x128xf32, #tpu.memory_space<vmem>>, vector<1x128x128xf32>
      %25 = vector.shape_cast %24 : vector<1x128x128xf32> to vector<128x128xf32>
      %cst_20 = arith.constant dense<0.000000e+00> : vector<16x128xf32>
      %26 = tpu.matmul %23, %25, %cst_20 {dimension_numbers = #tpu.dot_dimension_numbers<[1], [0], [0], [1], [0, 0, 1, 1], [], []>} : vector<16x128xf32>, vector<128x128xf32>, vector<16x128xf32> -> vector<16x128xf32>
      %c0_21 = arith.constant 0 : index
      %c0_22 = arith.constant 0 : index
      %27 = vector.load %arg8[%c0_21, %c0_22] : memref<16x128xf32, #tpu.memory_space<vmem>>, vector<16x128xf32>
      tpu.vector_store %arg8[%c0_21, %c0_22], %26 {strides = array<i32>} : memref<16x128xf32, #tpu.memory_space<vmem>>, vector<16x128xf32>,
      %cst_23 = arith.constant 0.000000e+00 : f32
      %28 = vector.broadcast %cst_23 : f32 to vector<16x128xf32>
      %c0_24 = arith.constant 0 : index
      %c0_25 = arith.constant 0 : index
      %29 = vector.load %arg9[%c0_24, %c0_25] : memref<16x128xf32, #tpu.memory_space<vmem>>, vector<16x128xf32>
      tpu.vector_store %arg9[%c0_24, %c0_25], %28 {strides = array<i32>} : memref<16x128xf32, #tpu.memory_space<vmem>>, vector<16x128xf32>,
    } else {
    }
    %c0 = arith.constant 0 : index
    %c0_4 = arith.constant 0 : index
    %8 = vector.load %arg8[%c0, %c0_4] : memref<16x128xf32, #tpu.memory_space<vmem>>, vector<16x128xf32>
    %c0_5 = arith.constant 0 : index
    %c0_6 = arith.constant 0 : index
    %9 = vector.load %arg9[%c0_5, %c0_6] : memref<16x128xf32, #tpu.memory_space<vmem>>, vector<16x128xf32>
    %c0_7 = arith.constant 0 : index
    %c0_8 = arith.constant 0 : index
    %10 = vector.load %arg2[%c0_7, %c0_8] : memref<16x16xf32, #tpu.memory_space<vmem>>, vector<16x16xf32>
    %cst = arith.constant dense<0.000000e+00> : vector<16x128xf32>
    %11 = tpu.matmul %10, %8, %cst {dimension_numbers = #tpu.dot_dimension_numbers<[1], [0], [0], [1], [0, 0, 1, 1], [], []>} : vector<16x16xf32>, vector<16x128xf32>, vector<16x128xf32> -> vector<16x128xf32>
    %12 = arith.addf %9, %11 : vector<16x128xf32>
    %c0_9 = arith.constant 0 : index
    %c0_10 = arith.constant 0 : index
    %13 = vector.load %arg9[%c0_9, %c0_10] : memref<16x128xf32, #tpu.memory_space<vmem>>, vector<16x128xf32>
    tpu.vector_store %arg9[%c0_9, %c0_10], %12 {strides = array<i32>} : memref<16x128xf32, #tpu.memory_space<vmem>>, vector<16x128xf32>,
    %c0_i32_11 = arith.constant 0 : i32
    %14 = arith.cmpi eq, %arg1, %c0_i32_11 : i32
    %c2_i32 = arith.constant 2 : i32
    %15 = arith.cmpi slt, %arg0, %c2_i32 : i32
    %16 = arith.andi %14, %15 : i1
    %17 = arith.extui %16 : i1 to i32
    %c0_i32_12 = arith.constant 0 : i32
    %18 = arith.cmpi ne, %17, %c0_i32_12 : i32
    scf.if %18 {
      %c0_15 = arith.constant 0 : index
      %c0_16 = arith.constant 0 : index
      %23 = vector.load %arg9[%c0_15, %c0_16] : memref<16x128xf32, #tpu.memory_space<vmem>>, vector<16x128xf32>
      %c0_17 = arith.constant 0 : index
      %c0_18 = arith.constant 0 : index
      %c0_19 = arith.constant 0 : index
      %24 = vector.load %arg5[%c0_17, %c0_18, %c0_19] : memref<1x1x128xf32, #tpu.memory_space<vmem>>, vector<1x1x128xf32>
      %25 = vector.shape_cast %24 : vector<1x1x128xf32> to vector<1x128xf32>
      %26 = vector.broadcast %25 : vector<1x128xf32> to vector<16x128xf32>
      %27 = arith.addf %23, %26 : vector<16x128xf32>
      %cst_20 = arith.constant 0.000000e+00 : f32
      %28 = vector.broadcast %cst_20 : f32 to vector<16x128xf32>
      %29 = arith.maximumf %27, %28 : vector<16x128xf32>
      %c0_21 = arith.constant 0 : index
      %c0_22 = arith.constant 0 : index
      %30 = vector.load %arg7[%c0_21, %c0_22] : memref<16x128xf32, #tpu.memory_space<vmem>>, vector<16x128xf32>
      tpu.vector_store %arg7[%c0_21, %c0_22], %29 {strides = array<i32>} : memref<16x128xf32, #tpu.memory_space<vmem>>, vector<16x128xf32>,
    } else {
    }
    %c2_i32_13 = arith.constant 2 : i32
    %19 = arith.cmpi eq, %arg0, %c2_i32_13 : i32
    %20 = arith.andi %14, %19 : i1
    %21 = arith.extui %20 : i1 to i32
    %c0_i32_14 = arith.constant 0 : i32
    %22 = arith.cmpi ne, %21, %c0_i32_14 : i32
    scf.if %22 {
      %c0_15 = arith.constant 0 : index
      %c0_16 = arith.constant 0 : index
      %23 = vector.load %arg9[%c0_15, %c0_16] : memref<16x128xf32, #tpu.memory_space<vmem>>, vector<16x128xf32>
      %c0_17 = arith.constant 0 : index
      %c0_18 = arith.constant 0 : index
      %c0_19 = arith.constant 0 : index
      %24 = vector.load %arg5[%c0_17, %c0_18, %c0_19] : memref<1x1x128xf32, #tpu.memory_space<vmem>>, vector<1x1x128xf32>
      %25 = vector.shape_cast %24 : vector<1x1x128xf32> to vector<1x128xf32>
      %26 = vector.broadcast %25 : vector<1x128xf32> to vector<16x128xf32>
      %27 = arith.addf %23, %26 : vector<16x128xf32>
      %28 = tpu.iota {dimensions = array<i32: 0>} : vector<16x128xi32>
      %c16_i32 = arith.constant 16 : i32
      %29 = vector.broadcast %c16_i32 : i32 to vector<16x128xi32>
      %30 = arith.cmpi slt, %28, %29 : vector<16x128xi32>
      %cst_20 = arith.constant 0.000000e+00 : f32
      %31 = vector.broadcast %cst_20 : f32 to vector<16x128xf32>
      %32 = arith.select %30, %27, %31 : vector<16x128xi1>, vector<16x128xf32>
      %cst_21 = arith.constant dense<0.000000e+00> : vector<128xf32>
      %33 = vector.multi_reduction <add>, %32, %cst_21 [0] : vector<16x128xf32> to vector<128xf32>
      %34 = vector.shape_cast %33 : vector<128xf32> to vector<1x128xf32>
      %cst_22 = arith.constant 6.250000e-02 : f32
      %35 = vector.broadcast %cst_22 : f32 to vector<1x128xf32>
      %36 = arith.mulf %34, %35 : vector<1x128xf32>
      %c0_23 = arith.constant 0 : index
      %c0_24 = arith.constant 0 : index
      %37 = vector.load %arg6[%c0_23, %c0_24] : memref<1x128xf32, #tpu.memory_space<vmem>>, vector<1x128xf32>
      tpu.vector_store %arg6[%c0_23, %c0_24], %36 {strides = array<i32>} : memref<1x128xf32, #tpu.memory_space<vmem>>, vector<1x128xf32>,
    } else {
    }
    return
  }
  func.func @transform_0(%arg0: i32, %arg1: i32) -> (i32, i32) {
    %c0_i32 = arith.constant 0 : i32
    %c0_i32_0 = arith.constant 0 : i32
    return %c0_i32, %arg1 : i32, i32
  }
  func.func @transform_1(%arg0: i32, %arg1: i32) -> (i32, i32) {
    %c0_i32 = arith.constant 0 : i32
    %c0_i32_0 = arith.constant 0 : i32
    %c0_i32_1 = arith.constant 0 : i32
    return %c0_i32, %c0_i32_0 : i32, i32
  }
  func.func @transform_2(%arg0: i32, %arg1: i32) -> (i32, i32, i32) {
    %c0_i32 = arith.constant 0 : i32
    %c0_i32_0 = arith.constant 0 : i32
    %c0_i32_1 = arith.constant 0 : i32
    return %arg0, %c0_i32, %c0_i32_0 : i32, i32, i32
  }
  func.func @transform_3(%arg0: i32, %arg1: i32) -> (i32, i32, i32) {
    %c0_i32 = arith.constant 0 : i32
    %c0_i32_0 = arith.constant 0 : i32
    %c0_i32_1 = arith.constant 0 : i32
    return %arg0, %c0_i32, %c0_i32_0 : i32, i32, i32
  }
  func.func @transform_4(%arg0: i32, %arg1: i32) -> (i32, i32) {
    %c0_i32 = arith.constant 0 : i32
    %c0_i32_0 = arith.constant 0 : i32
    %c0_i32_1 = arith.constant 0 : i32
    return %c0_i32, %c0_i32_0 : i32, i32
  }
}

</mosaic_0001>

<bundles_post_ra>
// kernel: tpu_custom_call.1
= control target key start
LH: loop header
LB: loop body
LE: loop exit
PB: predicated region body
PF: predicated region fallthrough
CT: control target
= control target key end

     0   :  { %9 = vsyncpa [#allocation6], 0  ;;  %s1283_s0 = inlined_call_operand.hbm [shape: f32[16,16], index: 0, kind: input, shape index: {}]   ;;  %s1284_s1 = inlined_call_operand.hbm [shape: f32[16,128], index: 1, kind: input, shape index: {}]   ;;  %s1285_s2 = inlined_call_operand.hbm [shape: f32[3,128,128], index: 2, kind: input, shape index: {}]   ;;  %s1286_s3 = inlined_call_operand.vmem [shape: f32[3,1,128], index: 3, kind: input, shape index: {}]   ;;  %s1287_s4 = inlined_call_operand.hbm [shape: f32[1,128], index: 4, kind: output, shape index: {}]  }
   0x1   :  { %10 = vsyncpa [#allocation9], 0 }
   0x2   :  { %11 = vsyncpa [#allocation7], 0  ;;  %s1034_s15 = smov 0   ;;  %s1036_s16 = smov 0  }
   0x3   :  { %s1038_s17 = smov 0   ;;  %s1040_s18 = smov 0  }
   0x4   :  { %s1042_s19 = smov 0   ;;  %s1044_s20 = smov 0  }
   0x5 LB: > { %s1063_s21 = sadd.s32 4294967295, %s1001_s20   ;;  %p90_p0 = scmp.ne.s32.totalorder %s989_s17, %s985_s16  ;;  %s1001_s20 = sphi %s1044_s20, %s17_s20   ;;  %s997_s19 = sphi %s1042_s19, %s1307_s19   ;;  %s993_s18 = sphi %s1040_s18, %s1306_s18   ;;  %s989_s17 = sphi %s1038_s17, %s1305_s17   ;;  %s985_s16 = sphi %s1036_s16, %s1304_s16   ;;  %s981_s15 = sphi %s1034_s15, %s1303_s15  }
   0x6   : > { %p91_p1 = scmp.eq.s32.totalorder %s1001_s20, 0  ;;  %p96_p2 = scmp.ne.s32.totalorder %s985_s16, %s981_s15 }
   0x7   : > { %p1288_p3 = scmp.eq.s32.totalorder %s1063_s21, 0  ;;  %p615_p4 = scmp.ge.s32.totalorder %s1001_s20, 1 }
   0x8   : > { %p92_p5 = por %p91_p1, %p90_p0  ;;  %p154_p6 = scmp.lt.s32.totalorder %s1001_s20, 4 }
   0x9   : > { %p1074_p7 = por %p1288_p3, %p96_p2  ;;  %s1003_s24 = smov [#allocation5]  }
   0xa   : > { %p1078_p8 = pnand %p615_p4, %p154_p6  ;;  %s168_s25 = sshll.u32 %s1003_s24, 4  ;;  %s169_s25 = int_to_ptr.vmem [resolvable:$true] %s168_s25 }
   0xb   : > { %s1292_s22 = scalar_select %p1074_p7, 1, 0 }
   0xc   : > { %s1293_s23 = scalar_select %p1078_p8, 1, 0 }
   0xd   : > { %p755_p9 = pneg %p1078_p8  ;;  %p768_p11 = scmp.lt.s32.totalorder %s1001_s20, 3 }
   0xe   : > { %s827_s30 = scalar_lea.hbm %s1283_s0, 256 }
   0xf   : > { %p1086_p10 = pnand %p755_p9, %p1288_p3  ;;  %p1091_p12 = pnand %p768_p11, %p92_p5 }
  0x10   : > { %p828_p13 = scmp.ne.s32.totalorder %s1283_s0, %s827_s30  ;;  %p834_p4 = scmp.lt.u32.totalorder %s827_s30, %s1283_s0 }
  0x11   : > { %s1295_s27 = scalar_select %p1091_p12, 1, 0 }
  0x12   : > { %p829_p0 = pneg %p1086_p10 }
  0x14   : > { %p830_p1 = pnand %p829_p0, %p828_p13 }
  0x16   : > { %p831_p2 = pneg %p830_p1 }
  0x18   : > { %p836_p5 = pnand %p834_p4, %p831_p2 }
  0x1a   : > { %839 = shalt.err (!%p836_p5)
}
  0x1b   : > { %s840_s9 = scalar_lea.vmem %s169_s25, 256  ;;  %p848_p3 = scmp.lt.s32.totalorder %s169_s25, %s169_s25 }
  0x1c   : > { %p841_p6 = scmp.ne.s32.totalorder %s169_s25, %s840_s9  ;;  %p849_p7 = scmp.lt.s32.totalorder %s840_s9, %s840_s9 }
  0x1e   : > { %p843_p9 = pnand %p841_p6, %p829_p0  ;;  %p850_p8 = por %p849_p7, %p848_p3 }
  0x20   : > { %p844_p11 = pneg %p843_p9 }
  0x22   : > { %p851_p12 = pnand %p850_p8, %p844_p11 }
  0x24   : > { %854 = shalt.err (!%p851_p12)
}
  0x25   : > { %s1004_s10 = smov 128   ;;  %s1005_s11 = smov 8  }
  0x26   : > { %758 = dma.hbm_to_vmem [thread:$0]  (!%p1086_p10), %s1283_s0, 256, %s169_s25, [#allocation6], %s1004_s10, %s1004_s10, %s1005_s11  }
  0x27   : > { %s1006_s14 = smov [#allocation8]   ;;  %s855_s29 = scalar_lea.hbm %s1284_s1, 256 }
  0x28   : > { %s181_s15 = sshll.u32 %s1006_s14, 4  ;;  %p856_p3 = scmp.ne.s32.totalorder %s1284_s1, %s855_s29  ;;  %s182_s15 = int_to_ptr.vmem [resolvable:$true] %s181_s15 }
  0x29   : > { %p862_p12 = scmp.lt.u32.totalorder %s855_s29, %s1284_s1 }
  0x2a   : > { %p858_p7 = pnand %p856_p3, %p829_p0 }
  0x2c   : > { %p859_p8 = pneg %p858_p7 }
  0x2e   : > { %p864_p13 = pnand %p862_p12, %p859_p8 }
  0x30   : > { %867 = shalt.err (!%p864_p13)
}
  0x31   : > { %s868_s25 = scalar_lea.vmem %s182_s15, 256  ;;  %p876_p5 = scmp.lt.s32.totalorder %s182_s15, %s182_s15 }
  0x32   : > { %p869_p1 = scmp.ne.s32.totalorder %s182_s15, %s868_s25  ;;  %p877_p6 = scmp.lt.s32.totalorder %s868_s25, %s868_s25 }
  0x34   : > { %p871_p2 = pnand %p869_p1, %p829_p0  ;;  %p878_p9 = por %p877_p6, %p876_p5 }
  0x36   : > { %p872_p4 = pneg %p871_p2 }
  0x38   : > { %p879_p11 = pnand %p878_p9, %p872_p4 }
  0x3a   : > { %882 = shalt.err (!%p879_p11)
}
  0x3b   : > { %761 = dma.hbm_to_vmem [thread:$0]  (!%p1086_p10), %s1284_s1, 256, %s182_s15, [#allocation9], %s1004_s10, %s1004_s10, %s1005_s11  }
  0x3c   : > { %s29_s12 = sadd.s32 1, %s997_s19  ;;  %s83_s13 = sadd.s32 1, %s989_s17 }
  0x3d   : > { %p31_p0 = scmp.ge.s32.totalorder %s29_s12, 3  ;;  %s195_s14 = sand.u32 1, %s1001_s20  }
  0x3e   : > { %s197_s26 = sand.u32 1, %s989_s17   ;;  %s637_s28 = sshll.u32 %s997_s19, 11 }
  0x3f   : > { %s1309_s12 = smov (%p31_p0, %s29_s12), 0  ;;  %s619_s24 = sshll.u32 %s197_s26, 7 }
  0x40   : > { %s80_s29 = ssub.s32 %s997_s19, %s1309_s12  ;;  %s1155_s6 = scalar_lea.hbm %s1285_s2, %s637_s28 }
  0x41   : > { %p81_p3 = scmp.eq.s32.totalorder %s80_s29, 0  ;;  %s199_s15 = scalar_lea.vmem [#allocation10], %s619_s24 }
  0x42   : > { %s206_s7 = sshll.u32 %s199_s15, 4  ;;  %s1162_s8 = scalar_lea.sflag [#allocation6], %s195_s14  ;;  %s1160_s7 = int_to_ptr.vmem [resolvable:$true] %s206_s7 }
  0x43   : > { %s1158_s25 = scalar_select %p81_p3, %s989_s17, %s83_s13  }
  0x44   : > { %s883_s9 = scalar_lea.hbm %s1155_s6, 2048  ;;  %p1296_p7 = scmp.ne.s32.totalorder %s1295_s27, 0 }
  0x45   : > { %p884_p10 = scmp.ne.s32.totalorder %s1155_s6, %s883_s9  ;;  %s888_s29 = scalar_lea.hbm %s1285_s2, 6144 }
  0x46   : > { %p885_p8 = pneg %p1296_p7  ;;  %p889_p1 = scmp.lt.u32.totalorder %s1155_s6, %s1285_s2 }
  0x47   : > { %p890_p2 = scmp.lt.u32.totalorder %s888_s29, %s883_s9  ;;  %p892_p5 = scmp.lt.u32.totalorder %s883_s9, %s1155_s6 }
  0x48   : > { %p886_p12 = pnand %p885_p8, %p884_p10 }
  0x49   : > { %p891_p4 = por %p890_p2, %p889_p1 }
  0x4a   : > { %p887_p13 = pneg %p886_p12 }
  0x4b   : > { %p893_p6 = por %p892_p5, %p891_p4 }
  0x4d   : > { %p894_p9 = pnand %p893_p6, %p887_p13 }
  0x4f   : > { %897 = shalt.err (!%p894_p9)
}
  0x50   : > { %s898_s13 = scalar_lea.vmem %s1160_s7, 2048  ;;  %s1007_s14 = smov [#allocation10]  }
  0x51   : > { %p899_p11 = scmp.ne.s32.totalorder %s1160_s7, %s898_s13  ;;  %s903_s5 = sshll.u32 %s1007_s14, 4  ;;  %s904_s5 = int_to_ptr.vmem [resolvable:$false] %s903_s5 }
  0x52   : > { %s905_s15 = scalar_lea.vmem %s904_s5, 4096  ;;  %p906_p10 = scmp.lt.s32.totalorder %s1160_s7, %s904_s5 }
  0x53   : > { %p901_p0 = pnand %p899_p11, %p885_p8  ;;  %p907_p12 = scmp.lt.s32.totalorder %s905_s15, %s898_s13 }
  0x55   : > { %p902_p3 = pneg %p901_p0  ;;  %p908_p1 = por %p907_p12, %p906_p10 }
  0x57   : > { %p909_p2 = pnand %p908_p1, %p902_p3 }
  0x59   : > { %912 = shalt.err (!%p909_p2)
}
  0x5a   : > { %765 = dma.hbm_to_vmem [thread:$0]  (!%p1296_p7), %s1155_s6, 2048, %s1160_s7, %s1162_s8, %s1004_s10, %s1004_s10, %s1005_s11  }
  0x5b   : > { %p1297_p8 = scmp.ne.s32.totalorder %s1293_s23, 0 }
  0x5c   : > { %p1298_p13 = scmp.eq.s32.totalorder (!%p1297_p8), %s1063_s21, 0 }
  0x5d   : > { %224 = sbr.rel (%p1297_p8) target bundleno = 651 (0x28b), region = 36 }
  0x64   : > { %964 = dma.done.wait (%p1298_p13), [#allocation6], 256   ;;  %p1299_p4 = pmov %p1298_p13 }
  0x66   : > { %966 = vsyncadd (%p1299_p4), [#allocation6], 4294967040  ;;  %p1300_p5 = pmov %p1299_p4 }
  0x67   : > { %p1301_p6 = pmov %p1299_p4 }
  0x68   : > { %968 = dma.done.wait (%p1300_p5), [#allocation9], 256  }
  0x69   : > { %970 = vsyncadd (%p1301_p6), [#allocation9], 4294967040  ;;  %s234_s27 = sand.u32 1, %s1063_s21   ;;  %s236_s10 = sand.u32 1, %s985_s16  }
  0x6a   : > { %s625_s11 = sshll.u32 %s236_s10, 7  ;;  %s235_s23 = scalar_lea.sflag [#allocation6], %s234_s27 }
  0x6b   : > { %s1205_s6 = scalar_lea.vmem [#allocation10], %s625_s11  ;;  %p1302_p7 = scmp.ne.s32.totalorder %s1292_s22, 0 }
  0x6d   : > { %972 = dma.done.wait (%p1302_p7), %s235_s23, 2048  }
  0x6e   : > { %974 = vsyncadd (%p1302_p7), %s235_s23, 4294965248  ;;  %p261_p9 = scmp.lt.s32.totalorder %s993_s18, 2  ;;  %p264_p11 = scmp.eq.s32.totalorder %s993_s18, 0 }
  0x6f   : > { %v270_v0 = vld [vmem:[#allocation8] sm:$0xff] (%p264_p11)  ;;  %v271_v1 = vld [vmem:[#allocation8 + $0x8] sm:$0xff] (%p264_p11) }
  0x70   : > { %s262_s7 = scalar_select %p261_p9, %s993_s18, 2 }
  0x71   : > { %269 = sbr.rel (!%p264_p11) target bundleno = 120 (0x78), region = 52  ;;  %272 = vst [vmem:[#allocation2] sm:$0xff] (%p264_p11), %v270_v0  ;;  %273 = vst [vmem:[#allocation2 + $0x8] sm:$0xff] (%p264_p11), %v271_v1 }
  0x72   : > { %s1219_s26 = scalar_lea.vmem %s1286_s3, %s262_s7 }
  0x78 PF: > { %v279_v2 = vld [vmem:[%s1205_s6] sm:$0xff]  ;;  %v280_v3 = vld [vmem:[%s1205_s6 + $0x8] sm:$0xff]  ;;  %v281_v4 = vld [vmem:[%s1205_s6 + $0x10] sm:$0xff]  ;;  %vm380_vm0 = vcmask 130048  }
  0x79   : > { %v705_v5 = vpack.c.bf16 %v280_v3, %v279_v2  ;;  %v282_v6 = vld [vmem:[%s1205_s6 + $0x18] sm:$0xff]  ;;  %v283_v8 = vld [vmem:[%s1205_s6 + $0x20] sm:$0xff]  ;;  %v284_v9 = vld [vmem:[%s1205_s6 + $0x28] sm:$0xff] }
  0x7a   : > { %v709_v7 = vpack.c.bf16 %v282_v6, %v281_v4  ;;  %v713_v10 = vpack.c.bf16 %v284_v9, %v283_v8  ;;  %v277_v11 = vld [vmem:[#allocation2] sm:$0xff]  ;;  %v285_v12 = vld [vmem:[%s1205_s6 + $0x30] sm:$0xff]  ;;  %v286_v13 = vld [vmem:[%s1205_s6 + $0x38] sm:$0xff] }
  0x7b   : > { %706 = vmatprep.subr.bf16.mxu0 %v705_v5  ;;  %695 = vmatprep.mubr.f32.mxu0 %v277_v11  ;;  %v717_v14 = vpack.c.bf16 %v286_v13, %v285_v12  ;;  %v287_v15 = vld [vmem:[%s1205_s6 + $0x40] sm:$0xff]  ;;  %v288_v16 = vld [vmem:[%s1205_s6 + $0x48] sm:$0xff]  ;;  %v289_v18 = vld [vmem:[%s1205_s6 + $0x50] sm:$0xff] }
  0x7c   : > { %708 = vmatpush3.bf16.msra.mxu0 %v705_v5  ;;  %v721_v17 = vpack.c.bf16 %v288_v16, %v287_v15  ;;  %v290_v19 = vld [vmem:[%s1205_s6 + $0x58] sm:$0xff]  ;;  %v291_v21 = vld [vmem:[%s1205_s6 + $0x60] sm:$0xff]  ;;  %v292_v22 = vld [vmem:[%s1205_s6 + $0x68] sm:$0xff] }
  0x7d   : > { %710 = vmatprep.subr.bf16.mxu0 %v709_v7  ;;  %v725_v20 = vpack.c.bf16 %v290_v19, %v289_v18  ;;  %v729_v23 = vpack.c.bf16 %v292_v22, %v291_v21  ;;  %v293_v24 = vld [vmem:[%s1205_s6 + $0x70] sm:$0xff]  ;;  %v294_v25 = vld [vmem:[%s1205_s6 + $0x78] sm:$0xff]  ;;  %v278_v27 = vld [vmem:[#allocation2 + $0x8] sm:$0xff] }
  0x7e   : > { %v733_v26 = vpack.c.bf16 %v294_v25, %v293_v24  ;;  %v378_v28 = vld [vmem:[#allocation5] sm:$0xff]  ;;  %v379_v32 = vld [vmem:[#allocation5 + $0x8] sm:$0xff] }
  0x7f   : > { %702 = vmatprep.mubr.msk.f32.mxu1 %vm380_vm0, %v378_v28  ;;  %v630_v36 = vld [vmem:[%s1219_s26] ss:$0 sm:$0xff] (%p261_p9) }
  0x80   : > { %712 = vmatpush3.bf16.msra.mxu0 %v709_v7 }
  0x81   : > { %714 = vmatprep.subr.bf16.mxu0 %v713_v10 }
  0x84   : > { %716 = vmatpush3.bf16.msra.mxu0 %v713_v10 }
  0x85   : > { %718 = vmatprep.subr.bf16.mxu0 %v717_v14 }
  0x88   : > { %720 = vmatpush3.bf16.msra.mxu0 %v717_v14 }
  0x89   : > { %722 = vmatprep.subr.bf16.mxu0 %v721_v17 }
  0x8c   : > { %724 = vmatpush3.bf16.msra.mxu0 %v721_v17 }
  0x8d   : > { %726 = vmatprep.subr.bf16.mxu0 %v725_v20 }
  0x90   : > { %728 = vmatpush3.bf16.msra.mxu0 %v725_v20 }
  0x91   : > { %730 = vmatprep.subr.bf16.mxu0 %v729_v23 }
  0x94   : > { %732 = vmatpush3.bf16.msra.mxu0 %v729_v23 }
  0x95   : > { %734 = vmatprep.subr.bf16.mxu0 %v733_v26 }
  0x98   : > { %736 = vmatpush3.bf16.msra.mxu0 %v733_v26 }
  0x9b   : > { %696 = vmatmul.mubr.f32.vlgmr.msra.gmra.mrb[0].mxu0 %v278_v27 }
 0x16e   : > { %v697_v29 = vpop.f32.mrb[0].mxu0 }
 0x16f   : > { %v361_v30 = vpop.f32.mrb[1].mxu0 }
 0x170   : > { %v737_v31 = vpack.c.bf16 %v697_v29, %v361_v30 }
 0x172   : > { %738 = vmatprep.subr.bf16.mxu1 %v737_v31 }
 0x173   : > { %740 = vmatpush3.bf16.msra.mxu1 %v737_v31 }
 0x176   : > { %703 = vmatmul.mubr.msk.f32.vlgmr.msra.gmra.mrb[0].mxu1 %vm380_vm0, %v379_v32 }
 0x245   : > { %470 = sbr.rel (!%p261_p9) target bundleno = 600 (0x258), region = 60 }
 0x249   : > { %v704_v33 = vpop.f32.mrb[0].mxu1 }
 0x24a   : > { %v453_v34 = vpop.f32.mrb[1].mxu1  ;;  %465 = vst [vmem:[#allocation4 + $0x8] sm:$0xff] %v704_v33 }
 0x24b   : > { %464 = vst [vmem:[#allocation4] sm:$0xff] %v453_v34 }
 0x251   : > { %v472_v37 = vld [vmem:[#allocation4 + $0x8] sm:$0xff] }
 0x252   : > { %v471_v35 = vld [vmem:[#allocation4] sm:$0xff]  ;;  %v481_v39 = vadd.f32 %v630_v36, %v472_v37 }
 0x253   : > { %v480_v38 = vadd.f32 %v630_v36, %v471_v35 }
 0x254   : > { %v483_v41 = vmax.f32 %v481_v39, 0.0 }
 0x255   : > { %v482_v40 = vmax.f32 %v480_v38, 0.0 }
 0x256   : > { %485 = vst [vmem:[#allocation2 + $0x8] sm:$0xff] %v483_v41 }
 0x257   : > { %484 = vst [vmem:[#allocation2] sm:$0xff] %v482_v40 }
 0x258 PF: > { %p486_p0 = scmp.eq.s32.totalorder %s993_s18, 2 }
 0x259   : > { %v632_v44 = vld [vmem:[%s1219_s26] ss:$0 sm:$0xff] (%p486_p0) }
 0x25a   : > { %490 = sbr.rel (!%p486_p0) target bundleno = 626 (0x272), region = 64 }
 0x25d   : > { %v492_v43 = vld [vmem:[#allocation4 + $0x8] sm:$0xff] (%p486_p0) }
 0x25e   : > { %v491_v42 = vld [vmem:[#allocation4] sm:$0xff] (%p486_p0)  ;;  %v501_v46 = vadd.f32 (%p486_p0), %v632_v44, %v492_v43 }
 0x25f   : > { %v500_v45 = vadd.f32 (%p486_p0), %v632_v44, %v491_v42 }
 0x261   : > { %v509_v47 = vadd.f32 %v501_v46, %v500_v45 }
 0x263   : > { %v510_v48 = vrot.slane %v509_v47, 4 }
 0x265   : > { %v511_v49 = vadd.f32 %v510_v48, %v509_v47 }
 0x267   : > { %v512_v50 = vrot.slane %v511_v49, 2 }
 0x269   : > { %v513_v51 = vadd.f32 %v512_v50, %v511_v49 }
 0x26b   : > { %v514_v52 = vrot.slane %v513_v51, 1 }
 0x26d   : > { %v515_v53 = vadd.f32 %v514_v52, %v513_v51 }
 0x26f   : > { %v516_v54 = vmul.f32 0.0625, %v515_v53 }
 0x271   : > { %517 = vst [vmem:[#allocation11] sm:$0x1] %v516_v54 }
 0x272 PF: > { %p771_p3 = scmp.eq.s32.totalorder %s1063_s21, 2  ;;  %s1008_s18 = smov [#allocation11]  }
 0x273   : > { %s525_s22 = sshll.u32 %s1008_s18, 4  ;;  %s526_s22 = int_to_ptr.vmem [resolvable:$true] %s525_s22 }
 0x274   : > { %s913_s28 = scalar_lea.vmem %s526_s22, 16  ;;  %s919_s29 = scalar_lea.vmem %s526_s22, 32 }
 0x275   : > { %p914_p10 = scmp.ne.s32.totalorder %s526_s22, %s913_s28  ;;  %p920_p2 = scmp.lt.s32.totalorder %s526_s22, %s526_s22 }
 0x276   : > { %p921_p8 = scmp.lt.s32.totalorder %s919_s29, %s913_s28 }
 0x277   : > { %p915_p12 = pnand %p914_p10, %p771_p3 }
 0x278   : > { %p922_p13 = por %p921_p8, %p920_p2 }
 0x279   : > { %p916_p1 = pneg %p915_p12 }
 0x27b   : > { %p923_p4 = pnand %p922_p13, %p916_p1 }
 0x27d   : > { %926 = shalt.err (!%p923_p4)
}
 0x27e   : > { %s927_s13 = scalar_lea.hbm %s1287_s4, 16 }
 0x27f   : > { %p928_p5 = scmp.ne.s32.totalorder %s1287_s4, %s927_s13  ;;  %p933_p9 = scmp.lt.u32.totalorder %s927_s13, %s1287_s4 }
 0x281   : > { %p929_p6 = pnand %p928_p5, %p771_p3 }
 0x283   : > { %p930_p7 = pneg %p929_p6 }
 0x285   : > { %p935_p11 = pnand %p933_p9, %p930_p7 }
 0x287   : > { %938 = shalt.err (!%p935_p11)
}
 0x288   : > { %752 = dma.vmem_to_hbm [thread:$0]  (%p771_p3), %s526_s22, 16, %s1287_s4, [#allocation7]  }
 0x289   : > { %976 = dma.done.wait (%p771_p3), [#allocation7], 16  }
 0x28a   : > { %978 = vsyncadd (%p771_p3), [#allocation7], 4294967280 }
 0x28b PF: > { %s17_s20 = sadd.s32 1, %s1001_s20   ;;  %s1303_s15 = smov %s985_s16 }
 0x28c   : > { %p14_p0 = scmp.ge.s32.totalorder %s17_s20, 5   ;;  %s1304_s16 = smov %s989_s17 }
 0x28d   : > { %s1305_s17 = smov %s1158_s25  ;;  %s1306_s18 = smov %s997_s19 }
 0x28e   : > { %s1307_s19 = smov %s1309_s12  ;;  %16 = sbr.rel (!%p14_p0) target bundleno = 5 (0x5), region = 100 }
 0x295   :  { %538 = vsyncpa [#allocation6], 1 }
 0x296   :  { %540 = vsyncpa [#allocation6 + $0x1], 1 }
 0x297   :  { %541 = vsyncpa [#allocation9], 1 }
 0x298   :  { %542 = vsyncpa [#allocation7], 1 }
 0x299   :  { %544 = vsyncpa [#allocation7 + $0x1], 1 }

</bundles_post_ra>
